<compile_context>
chip_gen: v7x
topology: tpu7x:2x2x1
jax: 0.10.0
libtpu: 0.0.40
codegen_flags: <defaults>
</compile_context>

<pallas_src>
import functools

import jax
import jax.numpy as jnp
from jax.experimental import pallas as pl
from jax.experimental.pallas import tpu as pltpu


def _round_up(x: int, m: int) -> int:
    return ((x + m - 1) // m) * m


def _canon(x):
    """Mirror the torch forward: squeeze a leading batch dim of 1, view as (N, 8)."""
    x = jnp.asarray(x)
    if x.ndim >= 3 and x.shape[0] == 1:
        x = jnp.squeeze(x, axis=0)
    return x.reshape(-1, 8)


@functools.lru_cache(maxsize=1)
def _pltpu_roll_is_jnp_roll() -> bool:
    """One-time probe: does pltpu.roll follow jnp.roll's convention
    (out[i] = in[i - shift])?  Guards the kernel against convention drift."""
    def _k(x_ref, o_ref):
        o_ref[...] = pltpu.roll(x_ref[...], 1, 1)

    x = jnp.tile(jnp.arange(128, dtype=jnp.float32)[None, :], (8, 1))
    out = pl.pallas_call(_k, out_shape=jax.ShapeDtypeStruct((8, 128), jnp.float32))(x)
    return bool(out[0, 0] == 127.0)


def _smooth_l1_obb_kernel(pred_ref, gt_ref, anc_ref, out_ref, acc_ref, *,
                          beta, num_steps, remaining_last, need_mask,
                          inv_denominator, roll_like_jnp):
    """Refs are (tile_rows, 128) blocks; each 128-lane row holds 16 anchors x
    [x0, y0, x1, y1, x2, y2, x3, y3]."""
    step = pl.program_id(0)

    @pl.when(step == 0)
    def _init():
        acc_ref[...] = jnp.zeros_like(acc_ref)

    p = pred_ref[...].astype(jnp.float32)
    g = gt_ref[...].astype(jnp.float32)
    a = anc_ref[...].astype(jnp.float32)

    def shift(x, off):
        # y[..., l] = x[..., (l + off) % 128]   (one XLU lane rotate)
        s = (-off) % 128 if roll_like_jnp else off % 128
        return pltpu.roll(x, s, axis=1)

    # --- per-anchor bbox diagonal, all work confined to each 8-lane group ----
    a2 = shift(a, 2)
    mn = jnp.minimum(a, a2)
    mx = jnp.maximum(a, a2)
    mn = jnp.minimum(mn, shift(mn, 4))            # lane l: min over {l, l+2, l+4, l+6}
    mx = jnp.maximum(mx, shift(mx, 4))
    ext = mx - mn                                 # lane 8g: w, lane 8g+1: h
    q = ext * ext
    d2 = q + shift(q, 1)                          # lane 8g: w^2 + h^2
    inv_diag = jax.lax.rsqrt(d2)                  # valid at lanes ≡ 0 (mod 8); EUP

    lane = jax.lax.broadcasted_iota(jnp.int32, inv_diag.shape, 1)
    v = inv_diag                                  # broadcast lane 8g -> lanes 8g..8g+7
    v = jnp.where((lane & 1) == 0, v, shift(v, -1))
    v = jnp.where((lane & 2) == 0, v, shift(v, -2))
    v = jnp.where((lane & 4) == 0, v, shift(v, -4))

    # --- encode + smooth L1 --------------------------------------------------
    r = p - (g - a) * v
    abs_r = jnp.abs(r)
    if beta > 0.0:
        loss = jnp.where(abs_r < beta, (0.5 / beta) * (r * r), abs_r - 0.5 * beta)
    else:                                         # beta == 0 -> pure L1 (matches torch)
        loss = abs_r

    # --- accumulate (tail mask only on the last step; select keeps NaNs out) -
    if need_mask:
        last = num_steps - 1

        @pl.when(step != last)
        def _acc_full():
            acc_ref[...] += loss

        @pl.when(step == last)
        def _acc_masked():
            row = jax.lax.broadcasted_iota(jnp.int32, loss.shape, 0)
            lin = row * 128 + lane
            # Padded / out-of-range lanes can hold NaN/inf (rsqrt(0), garbage
            # block tail) -> must stay a select, never multiplicative masking.
            acc_ref[...] += jnp.where(lin < remaining_last, loss, 0.0)
    else:
        acc_ref[...] += loss

    @pl.when(step == num_steps - 1)
    def _finish():
        out_ref[0, 0] = jnp.sum(acc_ref[...]) * inv_denominator


def smooth_l1_obb_loss(pred_deltas, gt_xy, anchors, *, beta=1.0, reduction="mean",
                       max_anchors_per_step=65536, min_anchors_for_kernel=4096):
    """Forward pass of SmoothL1OBBLoss.

    'mean'/'sum' use the Pallas kernel for large N; small N and 'none' use the
    pure-JAX path (cheaper than a kernel launch / needs a full tensor output).
    """
    if reduction not in ("mean", "sum", "none"):
        raise ValueError(f"unknown reduction: {reduction!r}")

    pred = _canon(pred_deltas)
    gt = _canon(gt_xy)
    anc = _canon(anchors)
    n = pred.shape[0]

    if reduction == "none" or n < min_anchors_for_kernel:
        # TODO(synk): reduction='none' has no Pallas path (full per-element output);
        # it and tiny-N problems are served by the fused pure-JAX path.
        return smooth_l1_obb_loss_ref(pred, gt, anc, beta=beta, reduction=reduction)

    # Pad anchors to a multiple of 16 only if needed (<= 15 rows), then view as
    # (N/16, 128): a free row-major bitcast reshape -- no transpose, no big pad.
    n16 = _round_up(n, 16)
    if n16 != n:
        padn = n16 - n
        pred = jnp.pad(pred, ((0, padn), (0, 0)))
        gt = jnp.pad(gt, ((0, padn), (0, 0)))
        anc = jnp.pad(anc, ((0, padn), (0, 0)))
    m = n16 // 16
    pred2 = pred.reshape(m, 128)
    gt2 = gt.reshape(m, 128)
    anc2 = anc.reshape(m, 128)

    max_rows = max(8, (int(max_anchors_per_step) // 16 // 8) * 8)
    tile_rows = m if m <= max_rows else max_rows       # full dim or multiple of 8
    num_steps = pl.cdiv(m, tile_rows)

    valid_elems = 8 * n
    remaining_last = valid_elems - (num_steps - 1) * tile_rows * 128
    need_mask = (num_steps * tile_rows * 128) != valid_elems
    inv_den = (1.0 / float(valid_elems)) if reduction == "mean" else 1.0

    kernel = functools.partial(
        _smooth_l1_obb_kernel,
        beta=float(beta),
        num_steps=int(num_steps),
        remaining_last=int(remaining_last),
        need_mask=bool(need_mask),
        inv_denominator=float(inv_den),
        roll_like_jnp=_pltpu_roll_is_jnp_roll(),
    )

    def _isz(x):
        return jnp.dtype(x.dtype).itemsize

    stream_bytes = 2 * tile_rows * 128 * (_isz(pred2) + _isz(gt2) + _isz(anc2))
    vmem_bytes = stream_bytes + tile_rows * 128 * 4          # + f32 accumulator
    vmem_limit = max(32 * 1024 * 1024, int(vmem_bytes * 1.25))

    out = pl.pallas_call(
        kernel,
        out_shape=jax.ShapeDtypeStruct((1, 1), jnp.float32),
        grid_spec=pltpu.PrefetchScalarGridSpec(
            num_scalar_prefetch=0,
            grid=(int(num_steps),),
            in_specs=[pl.BlockSpec((tile_rows, 128), lambda i: (i, 0))
                      for _ in range(3)],
            out_specs=pl.BlockSpec(memory_space=pltpu.MemorySpace.SMEM),
            scratch_shapes=[pltpu.VMEM((tile_rows, 128), jnp.float32)],
        ),
        compiler_params=pltpu.CompilerParams(
            dimension_semantics=("arbitrary",),
            vmem_limit_bytes=vmem_limit,
        ),
    )(pred2, gt2, anc2)
    return out[0, 0]


def smooth_l1_obb_loss_ref(pred_deltas, gt_xy, anchors, *, beta=1.0, reduction="mean"):
    """Pure-JAX reference mirroring the PyTorch module semantics."""
    pred = _canon(pred_deltas).astype(jnp.float32)
    gt = _canon(gt_xy).astype(jnp.float32)
    anc = _canon(anchors).astype(jnp.float32)
    a = anc.reshape(-1, 4, 2)
    w = a[..., 0].max(axis=-1) - a[..., 0].min(axis=-1)
    h = a[..., 1].max(axis=-1) - a[..., 1].min(axis=-1)
    diag = jnp.sqrt(w * w + h * h)
    gt_deltas = (gt - anc) / diag[:, None]
    r = pred - gt_deltas
    abs_r = jnp.abs(r)
    if beta > 0.0:
        loss = jnp.where(abs_r < beta, 0.5 * r * r / beta, abs_r - 0.5 * beta)
    else:
        loss = abs_r
    if reduction == "mean":
        return loss.mean()
    if reduction == "sum":
        return loss.sum()
    return loss


def _make_inputs(key, n, batch_dim=False, noise=5.0):
    kc, ks, kg, kp = jax.random.split(key, 4)
    centers = jax.random.uniform(kc, (n, 2), minval=50.0, maxval=200.0)
    sizes = jax.random.uniform(ks, (n, 2), minval=10.0, maxval=60.0)
    half = sizes / 2.0
    verts = jnp.stack([
        jnp.stack([centers[:, 0] - half[:, 0], centers[:, 1] - half[:, 1]], -1),
        jnp.stack([centers[:, 0] + half[:, 0], centers[:, 1] - half[:, 1]], -1),
        jnp.stack([centers[:, 0] + half[:, 0], centers[:, 1] + half[:, 1]], -1),
        jnp.stack([centers[:, 0] - half[:, 0], centers[:, 1] + half[:, 1]], -1),
    ], axis=1)                                   # (n, 4, 2) axis-aligned anchor vertices
    anchors = verts.reshape(n, 8).astype(jnp.float32)
    gt_xy = anchors + noise * jax.random.normal(kg, (n, 8), dtype=jnp.float32)
    pred = 0.1 * jax.random.normal(kp, (n, 8), dtype=jnp.float32)
    if batch_dim:
        return pred[None], gt_xy[None], anchors[None]
    return pred, gt_xy, anchors


if __name__ == "__main__":
    key = jax.random.PRNGKey(0)
    k1, k2, k3 = jax.random.split(key, 3)

    # Case 1: (1, N, 8), N=41 -> squeeze path + N%16 pad, single grid step.
    pred1, gt1, anc1 = _make_inputs(k1, n=41, batch_dim=True)
    out_mean = jax.block_until_ready(
        smooth_l1_obb_loss(pred1, gt1, anc1, min_anchors_for_kernel=0))
    ref_mean = smooth_l1_obb_loss_ref(pred1, gt1, anc1)
    assert jnp.allclose(out_mean, ref_mean, rtol=1e-5, atol=1e-6), (out_mean, ref_mean)

    out_sum = jax.block_until_ready(
        smooth_l1_obb_loss(pred1, gt1, anc1, reduction="sum", min_anchors_for_kernel=0))
    ref_sum = smooth_l1_obb_loss_ref(pred1, gt1, anc1, reduction="sum")
    assert jnp.allclose(out_sum, ref_sum, rtol=1e-5, atol=1e-4), (out_sum, ref_sum)

    # Case 2: (N, 8), N=1000, small per-step tile -> multi-step grid, ragged
    # last block + gated tail mask; beta=0.5.
    pred2, gt2, anc2 = _make_inputs(k2, n=1000, batch_dim=False, noise=40.0)
    out2 = jax.block_until_ready(
        smooth_l1_obb_loss(pred2, gt2, anc2, beta=0.5,
                           max_anchors_per_step=256, min_anchors_for_kernel=0))
    ref2 = smooth_l1_obb_loss_ref(pred2, gt2, anc2, beta=0.5)
    assert jnp.allclose(out2, ref2, rtol=1e-5, atol=1e-6), (out2, ref2)

    # Case 3: N % 16 == 0 -> no tail mask, single step, default tile.
    pred3, gt3, anc3 = _make_inputs(k3, n=512, batch_dim=False)
    out3 = jax.block_until_ready(
        smooth_l1_obb_loss(pred3, gt3, anc3, min_anchors_for_kernel=0))
    ref3 = smooth_l1_obb_loss_ref(pred3, gt3, anc3)
    assert jnp.allclose(out3, ref3, rtol=1e-5, atol=1e-6), (out3, ref3)

    # Pure-JAX fallback paths: reduction='none' and small-N default threshold.
    out_none = smooth_l1_obb_loss(pred3, gt3, anc3, reduction="none")
    ref_none = smooth_l1_obb_loss_ref(pred3, gt3, anc3, reduction="none")
    assert jnp.allclose(out_none, ref_none, rtol=1e-6, atol=1e-6)
    out_small = jax.block_until_ready(smooth_l1_obb_loss(pred3, gt3, anc3))  # N < 4096 -> JAX path
    assert jnp.allclose(out_small, ref3, rtol=1e-6, atol=1e-6)

    print("KERNEL_OK")
</pallas_src>

<mosaic_0001>
module attributes {stable_mosaic.version = 11 : i64} {
  func.func @_k(%arg0: memref<8x128xf32, #tpu.memory_space<vmem>>, %arg1: memref<8x128xf32, #tpu.memory_space<vmem>>) attributes {dimension_semantics = [], scalar_prefetch = 0 : i64, scratch_operands = 0 : i64, tpu.core_type = #tpu.core_type<tc>} {
    %c0 = arith.constant 0 : index
    %c0_0 = arith.constant 0 : index
    %0 = vector.load %arg0[%c0, %c0_0] : memref<8x128xf32, #tpu.memory_space<vmem>>, vector<8x128xf32>
    %c1_i32 = arith.constant 1 : i32
    %1 = tpu.dynamic_rotate %0 by %c1_i32 dim 1 : vector<8x128xf32>, i32 -> vector<8x128xf32>
    %c0_1 = arith.constant 0 : index
    %c0_2 = arith.constant 0 : index
    %2 = vector.load %arg1[%c0_1, %c0_2] : memref<8x128xf32, #tpu.memory_space<vmem>>, vector<8x128xf32>
    tpu.vector_store %arg1[%c0_1, %c0_2], %1 {strides = array<i32>} : memref<8x128xf32, #tpu.memory_space<vmem>>, vector<8x128xf32>,
    return
  }
}

</mosaic_0001>

<bundles_post_ra>
// kernel: tpu_custom_call.1
= control target key start
LH: loop header
LB: loop body
LE: loop exit
PB: predicated region body
PF: predicated region fallthrough
CT: control target
= control target key end

     0   :  { %6 = vsyncpa [#allocation3], 0  ;;  %s128_s0 = inlined_call_operand.hbm [shape: f32[8,128], index: 0, kind: input, shape index: {}]   ;;  %s129_s1 = inlined_call_operand.hbm [shape: f32[8,128], index: 1, kind: output, shape index: {}]  }
   0x1   :  { %7 = vsyncpa [#allocation4], 0  ;;  %s91_s6 = smov [#allocation2]   ;;  %s43_s10 = scalar_lea.hbm %s128_s0, 128 }
   0x2   :  { %s14_s7 = sshll.u32 %s91_s6, 4  ;;  %p44_p0 = scmp.ne.s32.totalorder %s128_s0, %s43_s10  ;;  %s15_s7 = int_to_ptr.vmem [resolvable:$true] %s14_s7 }
   0x3   :  { %p47_p1 = scmp.lt.u32.totalorder %s43_s10, %s128_s0 }
   0x5   :  { %p49_p2 = pnand %p47_p1, %p44_p0 }
   0x7   :  { %52 = shalt.err (!%p49_p2)
}
   0x8   :  { %s53_s15 = scalar_lea.vmem %s15_s7, 128  ;;  %p58_p4 = scmp.lt.s32.totalorder %s15_s7, %s15_s7 }
   0x9   :  { %p54_p3 = scmp.ne.s32.totalorder %s15_s7, %s53_s15  ;;  %p59_p5 = scmp.lt.s32.totalorder %s53_s15, %s53_s15 }
   0xb   :  { %p60_p6 = por %p59_p5, %p58_p4 }
   0xd   :  { %p61_p7 = pnand %p60_p6, %p54_p3 }
   0xf   :  { %64 = shalt.err (!%p61_p7)
}
  0x10   :  { %17 = dma.hbm_to_vmem [thread:$0]  %s128_s0, 128, %s15_s7, [#allocation3]  }
  0x11   :  { %87 = dma.done.wait [#allocation3], 128  }
  0x12   :  { %88 = vsyncadd [#allocation3], 4294967168  ;;  %v21_v0 = vld [vmem:[#allocation2] sm:$0xff]  ;;  %s92_s18 = smov 1   ;;  %s93_s19 = smov [#allocation5]  }
  0x13   :  { %22 = vrot.lane.b32.xlu0 %v21_v0, %s92_s18  ;;  %s31_s20 = sshll.u32 %s93_s19, 4  ;;  %s32_s20 = int_to_ptr.vmem [resolvable:$true] %s31_s20 }
  0x14   :  { %s65_s21 = scalar_lea.vmem %s32_s20, 128  ;;  %p70_p9 = scmp.lt.s32.totalorder %s32_s20, %s32_s20 }
  0x15   :  { %p66_p8 = scmp.ne.s32.totalorder %s32_s20, %s65_s21  ;;  %p71_p10 = scmp.lt.s32.totalorder %s65_s21, %s65_s21 }
  0x17   :  { %p72_p11 = por %p71_p10, %p70_p9 }
  0x19   :  { %p73_p12 = pnand %p72_p11, %p66_p8 }
  0x85   :  { %v23_v1 = vpop.permute.xlu0 %22 }
  0x86   :  { %24 = vst [vmem:[#allocation5] sm:$0xff] %v23_v1 }
  0x87   :  { %76 = shalt.err (!%p73_p12)
}
  0x88   :  { %s77_s0 = scalar_lea.hbm %s129_s1, 128 }
  0x89   :  { %p78_p13 = scmp.ne.s32.totalorder %s129_s1, %s77_s0  ;;  %p81_p0 = scmp.lt.u32.totalorder %s77_s0, %s129_s1 }
  0x8b   :  { %p83_p1 = pnand %p81_p0, %p78_p13 }
  0x8d   :  { %86 = shalt.err (!%p83_p1)
}
  0x8e   :  { %34 = dma.vmem_to_hbm [thread:$0]  %s32_s20, 128, %s129_s1, [#allocation4]  }
  0x8f   :  { %89 = dma.done.wait [#allocation4], 128  }
  0x90   :  { %90 = vsyncadd [#allocation4], 4294967168 }
  0x91   :  { %38 = vsyncpa [#allocation3], 1 }
  0x92   :  { %39 = vsyncpa [#allocation4], 1 }

</bundles_post_ra>
